<compile_context>
chip_gen: v7x
topology: tpu7x:2x2x1
jax: 0.10.0
libtpu: 0.0.40
codegen_flags: <defaults>
</compile_context>

<pallas_src>
import functools

import jax
import jax.numpy as jnp
from jax.experimental import pallas as pl
from jax.experimental.pallas import tpu as pltpu

EPS = 1e-5                      # PyTorch BatchNorm default
VMEM_LIMIT = 32 * 1024 * 1024   # explicit scoped-VMEM budget for the GEMMs


def _round_up(x, m):
    return (x + m - 1) // m * m


def _pick_m_tile(M):
    for t in (256, 128, 64, 32, 16, 8):
        if M % t == 0:
            return t, M
    Mp = _round_up(M, 8)
    if Mp <= 512:
        return Mp, Mp
    Mp = _round_up(M, 128)
    return 128, Mp


def _pick_rows_tile(M):
    for t in (512, 256, 128, 64, 32, 16, 8):
        if M % t == 0:
            return t
    return M


def _pick_lane_tile(L):
    for t in (256, 128):
        if L % t == 0:
            return t
    return L


def _lane_view(x2d):
    """Pack narrow-channel (C < 128) activations two rows per 128-lane vreg so
    every elementwise load/store is lane-dense. The reshape is a free bitcast
    (row-major contiguous)."""
    M, C = x2d.shape
    if C % 128 == 0:
        return x2d, 1
    if C < 128 and 128 % C == 0 and M % (128 // C) == 0:
        rep = 128 // C
        return x2d.reshape(M // rep, C * rep), rep
    return x2d, 1


# --------------------------------------------------------------------------
# GEMM with tap-decomposed reduction: out = sum_t a_t @ b[t] (+ bias).
# bf16 operands (MXU-native), f32 accumulation in a VMEM scratch, B resident
# in VMEM across the whole M grid (fetched from HBM exactly once).
# --------------------------------------------------------------------------
def _taps_gemm_kernel(*refs, n_taps, has_bias):
    a_refs = refs[:n_taps]
    b_ref = refs[n_taps]
    pos = n_taps + 1
    bias_ref = None
    if has_bias:
        bias_ref = refs[pos]
        pos += 1
    o_ref = refs[pos]
    acc_ref = refs[pos + 1]

    acc_ref[...] = jnp.dot(a_refs[0][...], b_ref[0],
                           preferred_element_type=jnp.float32)
    for t in range(1, n_taps):
        acc_ref[...] += jnp.dot(a_refs[t][...], b_ref[t],
                                preferred_element_type=jnp.float32)
    acc = acc_ref[...]
    if has_bias:
        acc = acc + bias_ref[...]
    o_ref[...] = acc.astype(o_ref.dtype)


def pallas_matmul_taps(a_list, b, bias=None, out_dtype=jnp.bfloat16):
    """a_list: list of (M, K) operands; b: (T, K, Co).  Returns (M, Co)."""
    n_taps = len(a_list)
    M, K = a_list[0].shape
    T, Kb, Co = b.shape
    assert T == n_taps and Kb == K

    tm, Mp = _pick_m_tile(M)
    Np = Co if (Co % 128 == 0 or Co <= 128) else _round_up(Co, 128)

    a_list = [a.astype(jnp.bfloat16) for a in a_list]
    if Mp != M:
        a_list = [jnp.pad(a, ((0, Mp - M), (0, 0))) for a in a_list]
    b = b.astype(jnp.bfloat16)
    if Np != Co:
        b = jnp.pad(b, ((0, 0), (0, 0), (0, Np - Co)))

    in_specs = [pl.BlockSpec((tm, K), lambda i: (i, 0)) for _ in range(n_taps)]
    # Weights fully resident across the M grid (constant block index).
    in_specs.append(pl.BlockSpec((n_taps, K, Np), lambda i: (0, 0, 0)))
    operands = list(a_list) + [b]
    if bias is not None:
        bias_p = bias.astype(jnp.float32)
        if Np != Co:
            bias_p = jnp.pad(bias_p, (0, Np - Co))
        in_specs.append(pl.BlockSpec((1, Np), lambda i: (0, 0)))
        operands.append(bias_p.reshape(1, Np))

    kernel = functools.partial(_taps_gemm_kernel, n_taps=n_taps,
                               has_bias=bias is not None)
    out = pl.pallas_call(
        kernel,
        out_shape=jax.ShapeDtypeStruct((Mp, Np), out_dtype),
        grid_spec=pltpu.PrefetchScalarGridSpec(
            num_scalar_prefetch=0,
            grid=(Mp // tm,),
            in_specs=in_specs,
            out_specs=pl.BlockSpec((tm, Np), lambda i: (i, 0)),
            scratch_shapes=[pltpu.VMEM((tm, Np), jnp.float32)],
        ),
        compiler_params=pltpu.CompilerParams(
            dimension_semantics=("parallel",),
            vmem_limit_bytes=VMEM_LIMIT),
    )(*operands)
    if (Mp, Np) != (M, Co):
        out = out[:M, :Co]
    return out


# --------------------------------------------------------------------------
# BatchNorm (training-mode batch statistics), two passes.
# Pass 1: per-lane sum / sumsq, M-tiled (reduction axis last, outputs resident).
# Pass 2: y = x*scale + shift (+residual)(+ReLU), fully tiled, bf16 output.
# --------------------------------------------------------------------------
def _bn_stats_kernel(x_ref, sum_ref, sq_ref):
    @pl.when(pl.program_id(1) == 0)
    def _():
        sum_ref[...] = jnp.zeros_like(sum_ref)
        sq_ref[...] = jnp.zeros_like(sq_ref)

    x = x_ref[...].astype(jnp.float32)
    sum_ref[...] += jnp.sum(x, axis=0, keepdims=True)
    sq_ref[...] += jnp.sum(x * x, axis=0, keepdims=True)


def pallas_bn_stats(xl):
    Mr, L = xl.shape
    tm = _pick_rows_tile(Mr)
    tc = _pick_lane_tile(L)
    return pl.pallas_call(
        _bn_stats_kernel,
        out_shape=(jax.ShapeDtypeStruct((1, L), jnp.float32),
                   jax.ShapeDtypeStruct((1, L), jnp.float32)),
        grid_spec=pltpu.PrefetchScalarGridSpec(
            num_scalar_prefetch=0,
            grid=(L // tc, Mr // tm),                   # reduction (M) last
            in_specs=[pl.BlockSpec((tm, tc), lambda c, m: (m, c))],
            out_specs=[pl.BlockSpec((1, tc), lambda c, m: (0, c)),
                       pl.BlockSpec((1, tc), lambda c, m: (0, c))],
        ),
        compiler_params=pltpu.CompilerParams(
            dimension_semantics=("parallel", "arbitrary")),
    )(xl)


def _bn_apply_kernel(*refs, relu, has_res):
    if has_res:
        x_ref, r_ref, scale_ref, shift_ref, o_ref = refs
    else:
        x_ref, scale_ref, shift_ref, o_ref = refs
        r_ref = None
    y = x_ref[...].astype(jnp.float32) * scale_ref[...] + shift_ref[...]
    if r_ref is not None:
        y = y + r_ref[...].astype(jnp.float32)      # residual add in f32
    if relu:
        y = jnp.maximum(y, 0.0)
    o_ref[...] = y.astype(o_ref.dtype)


def pallas_bn_apply(xl, scale_l, shift_l, relu, res_l=None,
                    out_dtype=jnp.bfloat16):
    Mr, L = xl.shape
    tm = _pick_rows_tile(Mr)
    tc = _pick_lane_tile(L)
    in_specs = [pl.BlockSpec((tm, tc), lambda i, c: (i, c))]
    operands = [xl]
    if res_l is not None:
        in_specs.append(pl.BlockSpec((tm, tc), lambda i, c: (i, c)))
        operands.append(res_l)
    in_specs += [pl.BlockSpec((1, tc), lambda i, c: (0, c)),
                 pl.BlockSpec((1, tc), lambda i, c: (0, c))]
    operands += [scale_l, shift_l]
    kernel = functools.partial(_bn_apply_kernel, relu=relu,
                               has_res=res_l is not None)
    return pl.pallas_call(
        kernel,
        out_shape=jax.ShapeDtypeStruct((Mr, L), out_dtype),
        grid_spec=pltpu.PrefetchScalarGridSpec(
            num_scalar_prefetch=0,
            grid=(Mr // tm, L // tc),
            in_specs=in_specs,
            out_specs=pl.BlockSpec((tm, tc), lambda i, c: (i, c)),
        ),
        compiler_params=pltpu.CompilerParams(
            dimension_semantics=("parallel", "parallel")),
    )(*operands)


def batchnorm_nhwc(x, gamma, beta, relu=True, residual=None):
    """Training-mode BatchNorm (+ReLU, + optional residual).  Statistics in
    f32, stored output bf16.  Running-stat updates intentionally absent
    (forward-only benchmark)."""
    N, H, W, C = x.shape
    M = N * H * W
    xl, rep = _lane_view(x.reshape(M, C))

    s_l, q_l = pallas_bn_stats(xl)
    s = s_l.reshape(rep, C).sum(axis=0)
    q = q_l.reshape(rep, C).sum(axis=0)
    mean = s / M
    var = jnp.maximum(q / M - mean * mean, 0.0)   # biased var (PyTorch fwd)
    scale = gamma * jax.lax.rsqrt(var + EPS)
    shift = beta - mean * scale
    scale_l = jnp.tile(scale, rep).reshape(1, C * rep)
    shift_l = jnp.tile(shift, rep).reshape(1, C * rep)

    res_l = None
    if residual is not None:
        res_l, _ = _lane_view(residual.reshape(M, C))
    y = pallas_bn_apply(xl, scale_l, shift_l, relu, res_l)
    return y.reshape(N, H, W, C)


# --------------------------------------------------------------------------
# MaxPool 3x3 / stride 2 / pad 1 : elementwise max of 9 shifted views (bf16,
# lane-packed, fully tiled parallel grid).
# TODO(synk): fuse the strided tap extraction into the kernel (element-offset
# BlockSpecs / manual DMA over the padded input) to avoid the 9 HBM view copies.
# --------------------------------------------------------------------------
def _max_kernel(*refs):
    *p_refs, o_ref = refs
    m = p_refs[0][...]
    for r in p_refs[1:]:
        m = jnp.maximum(m, r[...])
    o_ref[...] = m


def pallas_maxpool3x3s2(x):
    N, H, W, C = x.shape
    k, s, p = 3, 2, 1
    Ho = (H + 2 * p - k) // s + 1
    Wo = (W + 2 * p - k) // s + 1
    xp = jnp.pad(x, ((0, 0), (p, p), (p, p), (0, 0)),
                 constant_values=-jnp.inf)
    M = N * Ho * Wo
    patches = [xp[:, ki:ki + (Ho - 1) * s + 1:s,
                     kj:kj + (Wo - 1) * s + 1:s, :].reshape(M, C)
               for ki in range(k) for kj in range(k)]
    rep = 1
    if C % 128 != 0 and C < 128 and 128 % C == 0 and M % (128 // C) == 0:
        rep = 128 // C
    Mr, L = M // rep, C * rep
    views = [pp.reshape(Mr, L) for pp in patches]
    tm = _pick_rows_tile(Mr)
    tc = _pick_lane_tile(L)
    out = pl.pallas_call(
        _max_kernel,
        out_shape=jax.ShapeDtypeStruct((Mr, L), x.dtype),
        grid_spec=pltpu.PrefetchScalarGridSpec(
            num_scalar_prefetch=0,
            grid=(Mr // tm, L // tc),
            in_specs=[pl.BlockSpec((tm, tc), lambda i, c: (i, c))] * 9,
            out_specs=pl.BlockSpec((tm, tc), lambda i, c: (i, c)),
        ),
        compiler_params=pltpu.CompilerParams(
            dimension_semantics=("parallel", "parallel")),
    )(*views)
    return out.reshape(N, Ho, Wo, C)


# --------------------------------------------------------------------------
# Global average pool (adaptive avg pool to 1x1) -- channel-tiled grid.
# --------------------------------------------------------------------------
def _avgpool_kernel(x_ref, o_ref):
    o_ref[...] = jnp.mean(x_ref[...].astype(jnp.float32), axis=1)


def pallas_global_avgpool(x):
    N, H, W, C = x.shape
    HW = H * W
    tc = _pick_lane_tile(C)
    return pl.pallas_call(
        _avgpool_kernel,
        out_shape=jax.ShapeDtypeStruct((N, C), jnp.float32),
        grid_spec=pltpu.PrefetchScalarGridSpec(
            num_scalar_prefetch=0,
            grid=(C // tc,),
            in_specs=[pl.BlockSpec((N, HW, tc), lambda c: (0, 0, c))],
            out_specs=pl.BlockSpec((N, tc), lambda c: (0, c)),
        ),
        compiler_params=pltpu.CompilerParams(
            dimension_semantics=("parallel",)),
    )(x.reshape(N, HW, C))


# --------------------------------------------------------------------------
# Conv2d.  Weights in PyTorch layout (C_out, C_in, kh, kw), bias-free.
#   * 1x1 convs: activation used directly as the GEMM A operand (no copies).
#   * 3x3 convs: kh*kw shifted tap views -> separate GEMM operands, reduced
#     inside the kernel (no im2col concat in HBM).
#   * 7x7 stem (Ci=3): tiny classic im2col with the K pad folded into the
#     concat (no separate full-tensor pad pass).
# --------------------------------------------------------------------------
def conv2d(x, w, stride, padding):
    N, H, W, C = x.shape
    Co, Ci, kh, kw = w.shape
    assert Ci == C
    Ho = (H + 2 * padding - kh) // stride + 1
    Wo = (W + 2 * padding - kw) // stride + 1
    M = N * Ho * Wo

    x = x.astype(jnp.bfloat16)
    wt = jnp.transpose(w, (2, 3, 1, 0)).astype(jnp.bfloat16)  # (kh,kw,Ci,Co)

    if kh == 1 and kw == 1:
        assert padding == 0
        src = x if stride == 1 else x[:, ::stride, ::stride, :]
        a_list = [src.reshape(M, Ci)]
        b = wt.reshape(1, Ci, Co)
    elif Ci % 8 == 0:
        xp = jnp.pad(x, ((0, 0), (padding, padding), (padding, padding),
                         (0, 0)))
        a_list = [xp[:, ki:ki + (Ho - 1) * stride + 1:stride,
                        kj:kj + (Wo - 1) * stride + 1:stride, :].reshape(M, Ci)
                  for ki in range(kh) for kj in range(kw)]
        b = wt.reshape(kh * kw, Ci, Co)
    else:
        xp = jnp.pad(x, ((0, 0), (padding, padding), (padding, padding),
                         (0, 0)))
        cols = [xp[:, ki:ki + (Ho - 1) * stride + 1:stride,
                      kj:kj + (Wo - 1) * stride + 1:stride, :].reshape(M, Ci)
                for ki in range(kh) for kj in range(kw)]
        K = kh * kw * Ci
        Kp = _round_up(K, 128)
        if Kp != K:
            cols.append(jnp.zeros((M, Kp - K), jnp.bfloat16))
        a_list = [jnp.concatenate(cols, axis=-1)]
        b2 = wt.reshape(K, Co)
        if Kp != K:
            b2 = jnp.pad(b2, ((0, Kp - K), (0, 0)))
        b = b2.reshape(1, Kp, Co)

    y = pallas_matmul_taps(a_list, b, out_dtype=jnp.bfloat16)
    return y.reshape(N, Ho, Wo, Co)


# --------------------------------------------------------------------------
# ResNet-50 parameters (deterministic random init) and forward pass
# --------------------------------------------------------------------------
class ParamGen:
    def __init__(self, seed=0):
        self.key = jax.random.PRNGKey(seed)

    def _next(self):
        self.key, sub = jax.random.split(self.key)
        return sub

    def conv(self, c_out, c_in, k):
        return 0.05 * jax.random.normal(self._next(), (c_out, c_in, k, k),
                                        jnp.float32)

    def bn(self, c):  # gamma=1, beta=0 (PyTorch default init)
        return jnp.ones((c,), jnp.float32), jnp.zeros((c,), jnp.float32)

    def linear(self, c_out, c_in):
        # Stored pre-transposed (c_in, c_out) so the fc GEMM needs no w.T.
        w_t = 0.05 * jax.random.normal(self._next(), (c_in, c_out), jnp.float32)
        b = jnp.zeros((c_out,), jnp.float32)
        return w_t, b


def make_bottleneck_params(pg, c_in, planes, stride, downsample):
    p = {
        "conv1": pg.conv(planes, c_in, 1), "bn1": pg.bn(planes),
        "conv2": pg.conv(planes, planes, 3), "bn2": pg.bn(planes),
        "conv3": pg.conv(planes * 4, planes, 1), "bn3": pg.bn(planes * 4),
        "stride": stride,
    }
    if downsample:
        p["ds_conv"] = pg.conv(planes * 4, c_in, 1)
        p["ds_bn"] = pg.bn(planes * 4)
    return p


def make_resnet50_params(seed=0):
    pg = ParamGen(seed)
    params = {"conv1": pg.conv(64, 3, 7), "bn1": pg.bn(64)}
    layers_cfg = [(64, 3, 1), (128, 4, 2), (256, 6, 2), (512, 3, 2)]
    c_in = 64
    for li, (planes, blocks, stride) in enumerate(layers_cfg, start=1):
        blist = []
        for bi in range(blocks):
            s = stride if bi == 0 else 1
            ds = bi == 0
            blist.append(make_bottleneck_params(pg, c_in, planes, s, ds))
            c_in = planes * 4
        params[f"layer{li}"] = blist
    params["fc"] = pg.linear(1000, 2048)
    return params


def bottleneck_forward(x, p):
    identity = x
    out = conv2d(x, p["conv1"], 1, 0)
    out = batchnorm_nhwc(out, *p["bn1"], relu=True)
    out = conv2d(out, p["conv2"], p["stride"], 1)
    out = batchnorm_nhwc(out, *p["bn2"], relu=True)
    out = conv2d(out, p["conv3"], 1, 0)
    if "ds_conv" in p:
        identity = conv2d(x, p["ds_conv"], p["stride"], 0)
        identity = batchnorm_nhwc(identity, *p["ds_bn"], relu=False)
    return batchnorm_nhwc(out, *p["bn3"], relu=True, residual=identity)


def resnet50_forward(x_nchw, params):
    # PyTorch input is NCHW; convert once to the kernel layout (NHWC, bf16).
    x = jnp.transpose(x_nchw, (0, 2, 3, 1)).astype(jnp.bfloat16)
    x = conv2d(x, params["conv1"], 2, 3)
    x = batchnorm_nhwc(x, *params["bn1"], relu=True)
    x = pallas_maxpool3x3s2(x)
    for li in range(1, 5):
        for bp in params[f"layer{li}"]:
            x = bottleneck_forward(x, bp)
    pooled = pallas_global_avgpool(x)                        # (N, 2048) f32
    w_t, b = params["fc"]
    logits = pallas_matmul_taps([pooled], w_t.reshape(1, *w_t.shape),
                                bias=b, out_dtype=jnp.float32)
    return logits


if __name__ == "__main__":
    key = jax.random.PRNGKey(0)
    # Small but ResNet-50-compatible input (NCHW, like the PyTorch module).
    x = jax.random.normal(key, (2, 3, 64, 64), dtype=jnp.float32)
    params = make_resnet50_params(seed=0)
    out = resnet50_forward(x, params)
    out = jax.block_until_ready(out)
    assert out.shape == (2, 1000) and out.dtype == jnp.float32
    assert bool(jnp.all(jnp.isfinite(out)))
    print("KERNEL_OK")
</pallas_src>

<mosaic_0001>
module attributes {stable_mosaic.version = 11 : i64} {
  func.func @_taps_gemm_kernel(%arg0: i32, %arg1: memref<256x256xbf16, #tpu.memory_space<vmem>>, %arg2: memref<1x256x64xbf16, #tpu.memory_space<vmem>>, %arg3: memref<256x64xbf16, #tpu.memory_space<vmem>>, %arg4: memref<256x64xf32, #tpu.memory_space<vmem>>) attributes {dimension_semantics = [#tpu.dimension_semantics<parallel>], iteration_bounds = array<i64: 8>, scalar_prefetch = 0 : i64, scratch_operands = 1 : i64, tpu.core_type = #tpu.core_type<tc>, window_params = [{transform_indices = @transform_0, window_bounds = array<i64: 256, 256>}, {pipeline_mode = #tpu.pipeline_mode<synchronous>, transform_indices = @transform_1, window_bounds = array<i64: 1, 256, 64>}, {transform_indices = @transform_2, window_bounds = array<i64: 256, 64>}]} {
    %c0 = arith.constant 0 : index
    %c0_0 = arith.constant 0 : index
    %0 = vector.load %arg1[%c0, %c0_0] : memref<256x256xbf16, #tpu.memory_space<vmem>>, vector<256x256xbf16>
    %c0_1 = arith.constant 0 : index
    %c0_2 = arith.constant 0 : index
    %c0_3 = arith.constant 0 : index
    %1 = vector.load %arg2[%c0_1, %c0_2, %c0_3] : memref<1x256x64xbf16, #tpu.memory_space<vmem>>, vector<1x256x64xbf16>
    %2 = vector.shape_cast %1 : vector<1x256x64xbf16> to vector<256x64xbf16>
    %cst = arith.constant dense<0.000000e+00> : vector<256x64xf32>
    %3 = tpu.matmul %0, %2, %cst {dimension_numbers = #tpu.dot_dimension_numbers<[1], [0], [0], [1], [0, 0, 1, 1], [], []>} : vector<256x256xbf16>, vector<256x64xbf16>, vector<256x64xf32> -> vector<256x64xf32>
    %c0_4 = arith.constant 0 : index
    %c0_5 = arith.constant 0 : index
    %4 = vector.load %arg4[%c0_4, %c0_5] : memref<256x64xf32, #tpu.memory_space<vmem>>, vector<256x64xf32>
    tpu.vector_store %arg4[%c0_4, %c0_5], %3 {strides = array<i32>} : memref<256x64xf32, #tpu.memory_space<vmem>>, vector<256x64xf32>,
    %c0_6 = arith.constant 0 : index
    %c0_7 = arith.constant 0 : index
    %5 = vector.load %arg4[%c0_6, %c0_7] : memref<256x64xf32, #tpu.memory_space<vmem>>, vector<256x64xf32>
    %6 = arith.truncf %5 : vector<256x64xf32> to vector<256x64xbf16>
    %c0_8 = arith.constant 0 : index
    %c0_9 = arith.constant 0 : index
    %7 = vector.load %arg3[%c0_8, %c0_9] : memref<256x64xbf16, #tpu.memory_space<vmem>>, vector<256x64xbf16>
    tpu.vector_store %arg3[%c0_8, %c0_9], %6 {strides = array<i32>} : memref<256x64xbf16, #tpu.memory_space<vmem>>, vector<256x64xbf16>,
    return
  }
  func.func @transform_0(%arg0: i32) -> (i32, i32) {
    %c0_i32 = arith.constant 0 : i32
    %c0_i32_0 = arith.constant 0 : i32
    return %arg0, %c0_i32 : i32, i32
  }
  func.func @transform_1(%arg0: i32) -> (i32, i32, i32) {
    %c0_i32 = arith.constant 0 : i32
    %c0_i32_0 = arith.constant 0 : i32
    %c0_i32_1 = arith.constant 0 : i32
    %c0_i32_2 = arith.constant 0 : i32
    return %c0_i32, %c0_i32_0, %c0_i32_1 : i32, i32, i32
  }
  func.func @transform_2(%arg0: i32) -> (i32, i32) {
    %c0_i32 = arith.constant 0 : i32
    %c0_i32_0 = arith.constant 0 : i32
    return %arg0, %c0_i32 : i32, i32
  }
}

</mosaic_0001>

<bundles_post_ra>
// kernel: tpu_custom_call.1
= control target key start
LH: loop header
LB: loop body
LE: loop exit
PB: predicated region body
PF: predicated region fallthrough
CT: control target
= control target key end

     0   :  { %7 = vsyncpa [#allocation4], 0  ;;  %s1674_s0 = inlined_call_operand.hbm [shape: bf16[2048,256], index: 0, kind: input, shape index: {}]   ;;  %s1675_s1 = inlined_call_operand.vmem [shape: bf16[1,256,64], index: 1, kind: input, shape index: {}]   ;;  %s1676_s2 = inlined_call_operand.vmem [shape: bf16[2048,64], index: 2, kind: output, shape index: {}]  }
   0x1   :  { %9 = vsyncpa [#allocation4 + $0x1], 0  ;;  %s1387_s9 = smov 0   ;;  %s1389_s10 = smov 0  }
   0x2   :  { %s1391_s11 = smov 0   ;;  %s1393_s12 = smov 0  }
   0x3 LB: > { %s942_s13 = sadd.s32 4294967295, %s1367_s12   ;;  %s1407_s14 = sadd.s32 1, %s1367_s12   ;;  %s1367_s12 = sphi %s1393_s12, %s1683_s12   ;;  %s1363_s11 = sphi %s1391_s11, %s1682_s11   ;;  %s1359_s10 = sphi %s1389_s10, %s1681_s10   ;;  %s1355_s9 = sphi %s1387_s9, %s1680_s9  }
   0x4   : > { %s19_s15 = ssub.s32 %s1367_s12, %s1407_s14  ;;  %s22_s16 = sadd.s32 1, %s1363_s11 }
   0x5   : > { %p20_p0 = scmp.eq.s32.totalorder %s19_s15, 0  ;;  %p29_p1 = scmp.ne.s32.totalorder %s1363_s11, %s1359_s10 }
   0x6   : > { %p30_p2 = scmp.eq.s32.totalorder %s1367_s12, 0  ;;  %p35_p3 = scmp.ne.s32.totalorder %s1359_s10, %s1355_s9 }
   0x7   : > { %s1417_s17 = scalar_select %p20_p0, %s1363_s11, %s22_s16  }
   0x8   : > { %p31_p4 = por %p30_p2, %p29_p1  ;;  %p36_p5 = scmp.eq.s32.totalorder %s942_s13, 0 }
   0x9   : > { %p1204_p6 = scmp.lt.s32.totalorder %s1367_s12, 8  ;;  %s109_s19 = sand.u32 1, %s1363_s11  }
   0xa   : > { %p1422_p7 = por %p36_p5, %p35_p3  ;;  %s946_s20 = sshll.u32 %s109_s19, 8 }
   0xb   : > { %s1037_s21 = sshll.u32 %s1367_s12, 12  ;;  %s113_s25 = scalar_lea.vmem [#allocation3], %s946_s20 }
   0xc   : > { %s1431_s24 = scalar_lea.hbm %s1674_s0, %s1037_s21  ;;  %s121_s26 = sshll.u32 %s113_s25, 4  ;;  %s1433_s26 = int_to_ptr.vmem [resolvable:$true] %s121_s26 }
   0xd   : > { %p1435_p8 = pnand %p1204_p6, %p31_p4  ;;  %s1440_s28 = scalar_lea.sflag [#allocation4], %s109_s19 }
   0xe   : > { %s1303_s29 = scalar_lea.hbm %s1431_s24, 4096  ;;  %s1308_s4 = scalar_lea.hbm %s1674_s0, 32768 }
   0xf   : > { %p1304_p10 = scmp.ne.s32.totalorder %s1431_s24, %s1303_s29  ;;  %p1305_p11 = pneg %p1435_p8 }
  0x10   : > { %p1309_p0 = scmp.lt.u32.totalorder %s1431_s24, %s1674_s0  ;;  %p1310_p1 = scmp.lt.u32.totalorder %s1308_s4, %s1303_s29 }
  0x11   : > { %p1306_p12 = pnand %p1305_p11, %p1304_p10  ;;  %p1312_p3 = scmp.lt.u32.totalorder %s1303_s29, %s1431_s24 }
  0x12   : > { %p1311_p2 = por %p1310_p1, %p1309_p0 }
  0x13   : > { %p1307_p13 = pneg %p1306_p12 }
  0x14   : > { %p1313_p4 = por %p1312_p3, %p1311_p2 }
  0x16   : > { %p1314_p5 = pnand %p1313_p4, %p1307_p13 }
  0x18   : > { %1317 = shalt.err (!%p1314_p5)
}
  0x19   : > { %s1318_s7 = scalar_lea.vmem %s1433_s26, 4096  ;;  %s1369_s8 = smov [#allocation3]  }
  0x1a   : > { %p1319_p6 = scmp.ne.s32.totalorder %s1433_s26, %s1318_s7  ;;  %s1323_s9 = sshll.u32 %s1369_s8, 4  ;;  %s1324_s9 = int_to_ptr.vmem [resolvable:$false] %s1323_s9 }
  0x1b   : > { %s1325_s15 = scalar_lea.vmem %s1324_s9, 8192  ;;  %p1326_p9 = scmp.lt.s32.totalorder %s1433_s26, %s1324_s9 }
  0x1c   : > { %p1321_p10 = pnand %p1319_p6, %p1305_p11  ;;  %p1327_p0 = scmp.lt.s32.totalorder %s1325_s15, %s1318_s7 }
  0x1e   : > { %p1322_p12 = pneg %p1321_p10  ;;  %p1328_p1 = por %p1327_p0, %p1326_p9 }
  0x20   : > { %p1329_p2 = pnand %p1328_p1, %p1322_p12 }
  0x22   : > { %1332 = shalt.err (!%p1329_p2)
}
  0x23   : > { %s1370_s16 = smov 128   ;;  %s1371_s19 = smov 8  }
  0x24   : > { %1203 = dma.hbm_to_vmem [thread:$0]  (!%p1435_p8), %s1431_s24, 4096, %s1433_s26, %s1440_s28, %s1370_s16, %s1370_s16, %s1371_s19  }
  0x25   : > { %p129_p11 = scmp.lt.s32.totalorder %s1367_s12, 9  ;;  %p1679_p13 = scmp.ge.s32.totalorder %s1367_s12, 1 }
  0x27   : > { %p130_p3 = pnand %p1679_p13, %p129_p11 }
  0x28   : > { %s135_s20 = sand.u32 (!%p130_p3), 1, %s1359_s10  }
  0x29   : > { %133 = sbr.rel (%p130_p3) target bundleno = 369 (0x171), region = 28  ;;  %s951_s21 = sshll.u32 (!%p130_p3), %s135_s20, 8 }
  0x2a   : > { %s136_s22 = scalar_lea.sflag (!%p130_p3), [#allocation4], %s135_s20  ;;  %s1472_s23 = scalar_lea.vmem (!%p130_p3), [#allocation3], %s951_s21 }
  0x30   : > { %1350 = dma.done.wait (%p1422_p7), %s136_s22, 4096  }
  0x31   : > { %1352 = vsyncadd (%p1422_p7), %s136_s22, 4294963200  ;;  %v1239_v0 = vld [vmem:[%s1675_s1 + $0x40] sm:$0xff]   ;;  %v1241_v2 = vld [vmem:[%s1675_s1 + $0x48] sm:$0xff]   ;;  %s952_s6 = sshll.u32 %s942_s13, 5  ;;  %vm649_vm0 = vcmask 523264   ;;  %vm842_vm1 = vcmask 519168  }
  0x32   : > { %v1240_v1 = vld [vmem:[%s1675_s1] sm:$0xff]   ;;  %1070 = vmatprep.subr.bf16.mxu0 %v1239_v0  ;;  %1182 = vmatprep.subr.bf16.mxu1 %v1239_v0  ;;  %v1242_v3 = vld [vmem:[%s1675_s1 + $0x8] sm:$0xff]   ;;  %v1243_v4 = vld [vmem:[%s1675_s1 + $0x50] sm:$0xff]   ;;  %p162_p7 = scmp.lt.s32.totalorder %s952_s6, 255 }
  0x33   : > { %1071 = vmatpush3.bf16.msra.mxu0 %v1240_v1  ;;  %1190 = vmatpush3.bf16.msra.mxu1 %v1240_v1  ;;  %v1244_v5 = vld [vmem:[%s1675_s1 + $0x10] sm:$0xff]   ;;  %v1245_v6 = vld [vmem:[%s1675_s1 + $0x58] sm:$0xff]   ;;  %v1247_v8 = vld [vmem:[%s1675_s1 + $0x60] sm:$0xff]  }
  0x34   : > { %1072 = vmatprep.subr.bf16.mxu0 %v1241_v2  ;;  %1183 = vmatprep.subr.bf16.mxu1 %v1241_v2  ;;  %v1246_v7 = vld [vmem:[%s1675_s1 + $0x18] sm:$0xff]   ;;  %v1248_v9 = vld [vmem:[%s1675_s1 + $0x20] sm:$0xff]   ;;  %v1249_v10 = vld [vmem:[%s1675_s1 + $0x68] sm:$0xff]   ;;  %s1685_s6 = smov (!%p162_p7, %s952_s6), 255 }
  0x35   : > { %v1257_v11 = vld [vmem:[%s1472_s23 + $0x4] ss:$8 sps:$4 sm:$0xff]   ;;  %v1251_v14 = vld [vmem:[%s1675_s1 + $0x70] sm:$0xff]   ;;  %v1253_v16 = vld [vmem:[%s1675_s1 + $0x78] sm:$0xff]   ;;  %s953_s12 = sshll.u32 %s1685_s6, 2 }
  0x36   : > { %v1260_v12 = vld [vmem:[%s1472_s23 + $0x84] ss:$8 sps:$4 sm:$0xff]   ;;  %520 = vmatprep.mubr.bf16.mxu0 %v1257_v11  ;;  %v1252_v15 = vld [vmem:[%s1675_s1 + $0x30] sm:$0xff]   ;;  %v1254_v17 = vld [vmem:[%s1675_s1 + $0x38] sm:$0xff]   ;;  %s1567_s7 = scalar_lea.vmem %s1676_s2, %s953_s12 }
  0x37   : > { %1073 = vmatpush3.bf16.msra.mxu0 %v1242_v3  ;;  %1191 = vmatpush3.bf16.msra.mxu1 %v1242_v3  ;;  %v1250_v13 = vld [vmem:[%s1675_s1 + $0x28] sm:$0xff]   ;;  %v1261_v20 = vld [vmem:[%s1472_s23 + $0x14] ss:$8 sps:$4 sm:$0xff]   ;;  %v1265_v22 = vld [vmem:[%s1472_s23 + $0x10] ss:$8 sps:$4 sm:$0xff]  }
  0x38   : > { %1074 = vmatprep.subr.bf16.mxu0 %v1243_v4  ;;  %1184 = vmatprep.subr.bf16.mxu1 %v1243_v4  ;;  %v1255_v18 = vld [vmem:[%s1472_s23] ss:$8 sps:$4 sm:$0xff]   ;;  %v1263_v21 = vld [vmem:[%s1472_s23 + $0x94] ss:$8 sps:$4 sm:$0xff]   ;;  %v1266_v23 = vld [vmem:[%s1472_s23 + $0x90] ss:$8 sps:$4 sm:$0xff]  }
  0x39   : > { %584 = vmatprep.mubr.bf16.mxu1 %v1260_v12  ;;  %v1258_v19 = vld [vmem:[%s1472_s23 + $0x80] ss:$8 sps:$4 sm:$0xff]   ;;  %v1267_v24 = vld [vmem:[%s1472_s23 + $0x24] ss:$8 sps:$4 sm:$0xff]   ;;  %v1273_v28 = vld [vmem:[%s1472_s23 + $0x34] ss:$8 sps:$4 sm:$0xff]  }
  0x3a   : > { %v1269_v25 = vld [vmem:[%s1472_s23 + $0xa4] ss:$8 sps:$4 sm:$0xff]   ;;  %v1271_v26 = vld [vmem:[%s1472_s23 + $0x20] ss:$8 sps:$4 sm:$0xff]   ;;  %v1275_v29 = vld [vmem:[%s1472_s23 + $0xb4] ss:$8 sps:$4 sm:$0xff]  }
  0x3b   : > { %1075 = vmatpush3.bf16.msra.mxu0 %v1244_v5  ;;  %1192 = vmatpush3.bf16.msra.mxu1 %v1244_v5  ;;  %v1272_v27 = vld [vmem:[%s1472_s23 + $0xa0] ss:$8 sps:$4 sm:$0xff]   ;;  %v1277_v30 = vld [vmem:[%s1472_s23 + $0x30] ss:$8 sps:$4 sm:$0xff]   ;;  %v1279_v32 = vld [vmem:[%s1472_s23 + $0x44] ss:$8 sps:$4 sm:$0xff]  }
  0x3c   : > { %1076 = vmatprep.subr.bf16.mxu0 %v1245_v6  ;;  %1185 = vmatprep.subr.bf16.mxu1 %v1245_v6  ;;  %v1278_v31 = vld [vmem:[%s1472_s23 + $0xb0] ss:$8 sps:$4 sm:$0xff]   ;;  %v1281_v33 = vld [vmem:[%s1472_s23 + $0xc4] ss:$8 sps:$4 sm:$0xff]   ;;  %v1283_v34 = vld [vmem:[%s1472_s23 + $0x40] ss:$8 sps:$4 sm:$0xff]  }
  0x3d   : > { %v1284_v35 = vld [vmem:[%s1472_s23 + $0xc0] ss:$8 sps:$4 sm:$0xff]   ;;  %v1285_v36 = vld [vmem:[%s1472_s23 + $0x54] ss:$8 sps:$4 sm:$0xff]   ;;  %v1289_v38 = vld [vmem:[%s1472_s23 + $0x50] ss:$8 sps:$4 sm:$0xff]  }
  0x3e   : > { %v1287_v37 = vld [vmem:[%s1472_s23 + $0xd4] ss:$8 sps:$4 sm:$0xff]   ;;  %v1290_v39 = vld [vmem:[%s1472_s23 + $0xd0] ss:$8 sps:$4 sm:$0xff]   ;;  %v1291_v40 = vld [vmem:[%s1472_s23 + $0x64] ss:$8 sps:$4 sm:$0xff]  }
  0x3f   : > { %1077 = vmatpush3.bf16.msra.mxu0 %v1246_v7  ;;  %1193 = vmatpush3.bf16.msra.mxu1 %v1246_v7  ;;  %v1293_v41 = vld [vmem:[%s1472_s23 + $0xe4] ss:$8 sps:$4 sm:$0xff]   ;;  %v1295_v42 = vld [vmem:[%s1472_s23 + $0x60] ss:$8 sps:$4 sm:$0xff]   ;;  %v1297_v44 = vld [vmem:[%s1472_s23 + $0x74] ss:$8 sps:$4 sm:$0xff]  }
  0x40   : > { %1078 = vmatprep.subr.bf16.mxu0 %v1247_v8  ;;  %1186 = vmatprep.subr.bf16.mxu1 %v1247_v8  ;;  %v1296_v43 = vld [vmem:[%s1472_s23 + $0xe0] ss:$8 sps:$4 sm:$0xff]   ;;  %v1299_v45 = vld [vmem:[%s1472_s23 + $0xf4] ss:$8 sps:$4 sm:$0xff]   ;;  %v1301_v46 = vld [vmem:[%s1472_s23 + $0x70] ss:$8 sps:$4 sm:$0xff]  }
  0x41   : > { %v1302_v47 = vld [vmem:[%s1472_s23 + $0xf0] ss:$8 sps:$4 sm:$0xff]  }
  0x43   : > { %1079 = vmatpush3.bf16.msra.mxu0 %v1248_v9  ;;  %1194 = vmatpush3.bf16.msra.mxu1 %v1248_v9 }
  0x44   : > { %1080 = vmatprep.subr.bf16.mxu0 %v1249_v10  ;;  %1187 = vmatprep.subr.bf16.mxu1 %v1249_v10 }
  0x47   : > { %1081 = vmatpush3.bf16.msra.mxu0 %v1250_v13  ;;  %1195 = vmatpush3.bf16.msra.mxu1 %v1250_v13 }
  0x48   : > { %1082 = vmatprep.subr.bf16.mxu0 %v1251_v14  ;;  %1188 = vmatprep.subr.bf16.mxu1 %v1251_v14 }
  0x4b   : > { %1083 = vmatpush3.bf16.msra.mxu0 %v1252_v15  ;;  %1196 = vmatpush3.bf16.msra.mxu1 %v1252_v15 }
  0x4c   : > { %1084 = vmatprep.subr.bf16.mxu0 %v1253_v16  ;;  %1189 = vmatprep.subr.bf16.mxu1 %v1253_v16 }
  0x4f   : > { %1085 = vmatpush3.bf16.msra.mxu0 %v1254_v17  ;;  %1197 = vmatpush3.bf16.msra.mxu1 %v1254_v17 }
  0x52   : > { %521 = vmatmul.mubr.bf16.vlgmr.msra.gmra.mrb[0].mxu0 %v1255_v18  ;;  %585 = vmatmul.mubr.bf16.vlgmr.msra.gmra.mrb[0].mxu1 %v1258_v19 }
  0x53   : > { %528 = vmatprep.mubr.bf16.mxu0 %v1261_v20  ;;  %592 = vmatprep.mubr.bf16.mxu1 %v1263_v21 }
  0x5a   : > { %529 = vmatmul.mubr.bf16.gmra.mrb[4].mxu0 %v1265_v22  ;;  %593 = vmatmul.mubr.bf16.gmra.mrb[4].mxu1 %v1266_v23 }
  0x5b   : > { %536 = vmatprep.mubr.bf16.mxu0 %v1267_v24  ;;  %600 = vmatprep.mubr.bf16.mxu1 %v1269_v25 }
  0x62   : > { %537 = vmatmul.mubr.bf16.gmra.mrb[8].mxu0 %v1271_v26  ;;  %601 = vmatmul.mubr.bf16.gmra.mrb[8].mxu1 %v1272_v27 }
  0x63   : > { %544 = vmatprep.mubr.bf16.mxu0 %v1273_v28  ;;  %608 = vmatprep.mubr.bf16.mxu1 %v1275_v29 }
  0x6a   : > { %545 = vmatmul.mubr.bf16.gmra.mrb[12].mxu0 %v1277_v30  ;;  %609 = vmatmul.mubr.bf16.gmra.mrb[12].mxu1 %v1278_v31 }
  0x6b   : > { %552 = vmatprep.mubr.bf16.mxu0 %v1279_v32  ;;  %616 = vmatprep.mubr.bf16.mxu1 %v1281_v33 }
  0x72   : > { %553 = vmatmul.mubr.bf16.gmra.mrb[16].mxu0 %v1283_v34  ;;  %617 = vmatmul.mubr.bf16.gmra.mrb[16].mxu1 %v1284_v35 }
  0x73   : > { %560 = vmatprep.mubr.bf16.mxu0 %v1285_v36  ;;  %624 = vmatprep.mubr.bf16.mxu1 %v1287_v37 }
  0x7a   : > { %561 = vmatmul.mubr.bf16.gmra.mrb[20].mxu0 %v1289_v38  ;;  %625 = vmatmul.mubr.bf16.gmra.mrb[20].mxu1 %v1290_v39 }
  0x7b   : > { %568 = vmatprep.mubr.bf16.mxu0 %v1291_v40  ;;  %632 = vmatprep.mubr.bf16.mxu1 %v1293_v41 }
  0x82   : > { %569 = vmatmul.mubr.bf16.gmra.mrb[24].mxu0 %v1295_v42  ;;  %633 = vmatmul.mubr.bf16.gmra.mrb[24].mxu1 %v1296_v43 }
  0x83   : > { %576 = vmatprep.mubr.bf16.mxu0 %v1297_v44  ;;  %640 = vmatprep.mubr.bf16.mxu1 %v1299_v45 }
  0x8a   : > { %577 = vmatmul.mubr.bf16.gmra.mrb[28].mxu0 %v1301_v46  ;;  %641 = vmatmul.mubr.bf16.gmra.mrb[28].mxu1 %v1302_v47 }
 0x125   : > { %v1086_v48 = vpop.f32.mrb[0].mxu0  ;;  %v1134_v49 = vpop.f32.mrb[0].mxu1 }
 0x126   : > { %v1087_v50 = vpop.f32.mrb[1].mxu0  ;;  %v1135_v51 = vpop.f32.mrb[1].mxu1 }
 0x127   : > { %v1088_v52 = vadd.f32 %v1087_v50, %v1086_v48  ;;  %v1136_v53 = vadd.f32 %v1135_v51, %v1134_v49  ;;  %v1089_v54 = vpop.f32.mrb[2].mxu0  ;;  %v1137_v55 = vpop.f32.mrb[2].mxu1 }
 0x128   : > { %v1090_v56 = vpop.f32.mrb[3].mxu0  ;;  %v1138_v57 = vpop.f32.mrb[3].mxu1 }
 0x129   : > { %650 = vst.msk [vmem:[#allocation2] sm:$0xff] %vm649_vm0, %v1088_v52  ;;  %666 = vst.msk [vmem:[#allocation2 + $0x80] sm:$0xff] %vm649_vm0, %v1136_v53  ;;  %v1091_v58 = vadd.f32 %v1090_v56, %v1089_v54  ;;  %v1139_v59 = vadd.f32 %v1138_v57, %v1137_v55 }
 0x12b   : > { %651 = vst.msk [vmem:[#allocation2 + $0x8] sm:$0xff] %vm649_vm0, %v1091_v58  ;;  %667 = vst.msk [vmem:[#allocation2 + $0x88] sm:$0xff] %vm649_vm0, %v1139_v59 }
 0x12d   : > { %v1092_v60 = vpop.f32.mrb[4].mxu0  ;;  %v1140_v61 = vpop.f32.mrb[4].mxu1 }
 0x12e   : > { %v1093_v62 = vpop.f32.mrb[5].mxu0  ;;  %v1141_v63 = vpop.f32.mrb[5].mxu1 }
 0x12f   : > { %v1094_v0 = vadd.f32 %v1093_v62, %v1092_v60  ;;  %v1142_v1 = vadd.f32 %v1141_v63, %v1140_v61  ;;  %v1095_v2 = vpop.f32.mrb[6].mxu0  ;;  %v1143_v3 = vpop.f32.mrb[6].mxu1 }
 0x130   : > { %v682_v4 = vld [vmem:[#allocation2] sm:$0xff]  ;;  %v1096_v6 = vpop.f32.mrb[7].mxu0  ;;  %v1144_v7 = vpop.f32.mrb[7].mxu1 }
 0x131   : > { %v698_v5 = vld [vmem:[#allocation2 + $0x80] sm:$0xff]  ;;  %v1038_v8 = vpack.c.bf16 %v682_v4, %v682_v4  ;;  %652 = vst.msk [vmem:[#allocation2 + $0x10] sm:$0xff] %vm649_vm0, %v1094_v0  ;;  %668 = vst.msk [vmem:[#allocation2 + $0x90] sm:$0xff] %vm649_vm0, %v1142_v1  ;;  %v1097_v10 = vadd.f32 %v1096_v6, %v1095_v2  ;;  %v1145_v11 = vadd.f32 %v1144_v7, %v1143_v3 }
 0x132   : > { %v1054_v9 = vpack.c.bf16 %v698_v5, %v698_v5  ;;  %v683_v12 = vld [vmem:[#allocation2 + $0x8] sm:$0xff] }
 0x133   : > { %v699_v13 = vld [vmem:[#allocation2 + $0x88] sm:$0xff]  ;;  %843 = vst.msk [vmem:[%s1567_s7] sm:$0xf] %vm842_vm1, %v1038_v8  ;;  %v1039_v14 = vpack.c.bf16 %v683_v12, %v683_v12 }
 0x134   : > { %859 = vst.msk [vmem:[%s1567_s7 + $0x40] sm:$0xf] %vm842_vm1, %v1054_v9  ;;  %v1055_v15 = vpack.c.bf16 %v699_v13, %v699_v13 }
 0x135   : > { %653 = vst.msk [vmem:[#allocation2 + $0x18] sm:$0xff] %vm649_vm0, %v1097_v10  ;;  %669 = vst.msk [vmem:[#allocation2 + $0x98] sm:$0xff] %vm649_vm0, %v1145_v11  ;;  %v1098_v16 = vpop.f32.mrb[8].mxu0  ;;  %v1146_v17 = vpop.f32.mrb[8].mxu1 }
 0x136   : > { %844 = vst.msk [vmem:[%s1567_s7 + $0x4] sm:$0xf] %vm842_vm1, %v1039_v14  ;;  %860 = vst.msk [vmem:[%s1567_s7 + $0x44] sm:$0xf] %vm842_vm1, %v1055_v15  ;;  %v1099_v18 = vpop.f32.mrb[9].mxu0  ;;  %v1147_v19 = vpop.f32.mrb[9].mxu1 }
 0x137   : > { %v1100_v20 = vadd.f32 %v1099_v18, %v1098_v16  ;;  %v1148_v21 = vadd.f32 %v1147_v19, %v1146_v17  ;;  %v1101_v22 = vpop.f32.mrb[10].mxu0  ;;  %v1149_v23 = vpop.f32.mrb[10].mxu1 }
 0x138   : > { %v684_v24 = vld [vmem:[#allocation2 + $0x10] sm:$0xff]  ;;  %v1102_v26 = vpop.f32.mrb[11].mxu0  ;;  %v1150_v27 = vpop.f32.mrb[11].mxu1 }
 0x139   : > { %v700_v25 = vld [vmem:[#allocation2 + $0x90] sm:$0xff]  ;;  %v1040_v28 = vpack.c.bf16 %v684_v24, %v684_v24  ;;  %654 = vst.msk [vmem:[#allocation2 + $0x20] sm:$0xff] %vm649_vm0, %v1100_v20  ;;  %670 = vst.msk [vmem:[#allocation2 + $0xa0] sm:$0xff] %vm649_vm0, %v1148_v21  ;;  %v1103_v30 = vadd.f32 %v1102_v26, %v1101_v22  ;;  %v1151_v31 = vadd.f32 %v1150_v27, %v1149_v23 }
 0x13a   : > { %v1056_v29 = vpack.c.bf16 %v700_v25, %v700_v25 }
 0x13b   : > { %845 = vst.msk [vmem:[%s1567_s7 + $0x8] sm:$0xf] %vm842_vm1, %v1040_v28 }
 0x13c   : > { %v685_v32 = vld [vmem:[#allocation2 + $0x18] sm:$0xff]  ;;  %861 = vst.msk [vmem:[%s1567_s7 + $0x48] sm:$0xf] %vm842_vm1, %v1056_v29 }
 0x13d   : > { %v701_v33 = vld [vmem:[#allocation2 + $0x98] sm:$0xff]  ;;  %v1041_v34 = vpack.c.bf16 %v685_v32, %v685_v32  ;;  %655 = vst.msk [vmem:[#allocation2 + $0x28] sm:$0xff] %vm649_vm0, %v1103_v30  ;;  %671 = vst.msk [vmem:[#allocation2 + $0xa8] sm:$0xff] %vm649_vm0, %v1151_v31  ;;  %v1104_v36 = vpop.f32.mrb[12].mxu0  ;;  %v1152_v37 = vpop.f32.mrb[12].mxu1 }
 0x13e   : > { %v1057_v35 = vpack.c.bf16 %v701_v33, %v701_v33  ;;  %v1105_v38 = vpop.f32.mrb[13].mxu0  ;;  %v1153_v39 = vpop.f32.mrb[13].mxu1 }
 0x13f   : > { %846 = vst.msk [vmem:[%s1567_s7 + $0xc] sm:$0xf] %vm842_vm1, %v1041_v34  ;;  %v1106_v40 = vadd.f32 %v1105_v38, %v1104_v36  ;;  %v1154_v41 = vadd.f32 %v1153_v39, %v1152_v37  ;;  %v1107_v42 = vpop.f32.mrb[14].mxu0  ;;  %v1155_v43 = vpop.f32.mrb[14].mxu1 }
 0x140   : > { %862 = vst.msk [vmem:[%s1567_s7 + $0x4c] sm:$0xf] %vm842_vm1, %v1057_v35  ;;  %v686_v44 = vld [vmem:[#allocation2 + $0x20] sm:$0xff]  ;;  %v1108_v46 = vpop.f32.mrb[15].mxu0  ;;  %v1156_v47 = vpop.f32.mrb[15].mxu1 }
 0x141   : > { %v702_v45 = vld [vmem:[#allocation2 + $0xa0] sm:$0xff]  ;;  %v1042_v48 = vpack.c.bf16 %v686_v44, %v686_v44  ;;  %656 = vst.msk [vmem:[#allocation2 + $0x30] sm:$0xff] %vm649_vm0, %v1106_v40  ;;  %672 = vst.msk [vmem:[#allocation2 + $0xb0] sm:$0xff] %vm649_vm0, %v1154_v41  ;;  %v1109_v50 = vadd.f32 %v1108_v46, %v1107_v42  ;;  %v1157_v51 = vadd.f32 %v1156_v47, %v1155_v43 }
 0x142   : > { %v1058_v49 = vpack.c.bf16 %v702_v45, %v702_v45 }
 0x143   : > { %847 = vst.msk [vmem:[%s1567_s7 + $0x10] sm:$0xf] %vm842_vm1, %v1042_v48 }
 0x144   : > { %v687_v52 = vld [vmem:[#allocation2 + $0x28] sm:$0xff]  ;;  %863 = vst.msk [vmem:[%s1567_s7 + $0x50] sm:$0xf] %vm842_vm1, %v1058_v49 }
 0x145   : > { %v703_v53 = vld [vmem:[#allocation2 + $0xa8] sm:$0xff]  ;;  %v1043_v54 = vpack.c.bf16 %v687_v52, %v687_v52  ;;  %657 = vst.msk [vmem:[#allocation2 + $0x38] sm:$0xff] %vm649_vm0, %v1109_v50  ;;  %673 = vst.msk [vmem:[#allocation2 + $0xb8] sm:$0xff] %vm649_vm0, %v1157_v51  ;;  %v1110_v56 = vpop.f32.mrb[16].mxu0  ;;  %v1158_v57 = vpop.f32.mrb[16].mxu1 }
 0x146   : > { %v1059_v55 = vpack.c.bf16 %v703_v53, %v703_v53  ;;  %v1111_v58 = vpop.f32.mrb[17].mxu0  ;;  %v1159_v59 = vpop.f32.mrb[17].mxu1 }
 0x147   : > { %848 = vst.msk [vmem:[%s1567_s7 + $0x14] sm:$0xf] %vm842_vm1, %v1043_v54  ;;  %v1112_v60 = vadd.f32 %v1111_v58, %v1110_v56  ;;  %v1160_v61 = vadd.f32 %v1159_v59, %v1158_v57  ;;  %v1113_v62 = vpop.f32.mrb[18].mxu0  ;;  %v1161_v63 = vpop.f32.mrb[18].mxu1 }
 0x148   : > { %864 = vst.msk [vmem:[%s1567_s7 + $0x54] sm:$0xf] %vm842_vm1, %v1059_v55  ;;  %v688_v0 = vld [vmem:[#allocation2 + $0x30] sm:$0xff]  ;;  %v1114_v2 = vpop.f32.mrb[19].mxu0  ;;  %v1162_v3 = vpop.f32.mrb[19].mxu1 }
 0x149   : > { %v704_v1 = vld [vmem:[#allocation2 + $0xb0] sm:$0xff]  ;;  %v1044_v4 = vpack.c.bf16 %v688_v0, %v688_v0  ;;  %658 = vst.msk [vmem:[#allocation2 + $0x40] sm:$0xff] %vm649_vm0, %v1112_v60  ;;  %674 = vst.msk [vmem:[#allocation2 + $0xc0] sm:$0xff] %vm649_vm0, %v1160_v61  ;;  %v1115_v6 = vadd.f32 %v1114_v2, %v1113_v62  ;;  %v1163_v7 = vadd.f32 %v1162_v3, %v1161_v63 }
 0x14a   : > { %v1060_v5 = vpack.c.bf16 %v704_v1, %v704_v1 }
 0x14b   : > { %849 = vst.msk [vmem:[%s1567_s7 + $0x18] sm:$0xf] %vm842_vm1, %v1044_v4 }
 0x14c   : > { %v689_v8 = vld [vmem:[#allocation2 + $0x38] sm:$0xff]  ;;  %865 = vst.msk [vmem:[%s1567_s7 + $0x58] sm:$0xf] %vm842_vm1, %v1060_v5 }
 0x14d   : > { %v705_v9 = vld [vmem:[#allocation2 + $0xb8] sm:$0xff]  ;;  %v1045_v10 = vpack.c.bf16 %v689_v8, %v689_v8  ;;  %659 = vst.msk [vmem:[#allocation2 + $0x48] sm:$0xff] %vm649_vm0, %v1115_v6  ;;  %675 = vst.msk [vmem:[#allocation2 + $0xc8] sm:$0xff] %vm649_vm0, %v1163_v7  ;;  %v1116_v12 = vpop.f32.mrb[20].mxu0  ;;  %v1164_v13 = vpop.f32.mrb[20].mxu1 }
 0x14e   : > { %v1061_v11 = vpack.c.bf16 %v705_v9, %v705_v9  ;;  %v1117_v14 = vpop.f32.mrb[21].mxu0  ;;  %v1165_v15 = vpop.f32.mrb[21].mxu1 }
 0x14f   : > { %850 = vst.msk [vmem:[%s1567_s7 + $0x1c] sm:$0xf] %vm842_vm1, %v1045_v10  ;;  %v1118_v16 = vadd.f32 %v1117_v14, %v1116_v12  ;;  %v1166_v17 = vadd.f32 %v1165_v15, %v1164_v13  ;;  %v1119_v18 = vpop.f32.mrb[22].mxu0  ;;  %v1167_v19 = vpop.f32.mrb[22].mxu1 }
 0x150   : > { %866 = vst.msk [vmem:[%s1567_s7 + $0x5c] sm:$0xf] %vm842_vm1, %v1061_v11  ;;  %v690_v20 = vld [vmem:[#allocation2 + $0x40] sm:$0xff]  ;;  %v1120_v22 = vpop.f32.mrb[23].mxu0  ;;  %v1168_v23 = vpop.f32.mrb[23].mxu1 }
 0x151   : > { %v706_v21 = vld [vmem:[#allocation2 + $0xc0] sm:$0xff]  ;;  %v1046_v24 = vpack.c.bf16 %v690_v20, %v690_v20  ;;  %660 = vst.msk [vmem:[#allocation2 + $0x50] sm:$0xff] %vm649_vm0, %v1118_v16  ;;  %676 = vst.msk [vmem:[#allocation2 + $0xd0] sm:$0xff] %vm649_vm0, %v1166_v17  ;;  %v1121_v26 = vadd.f32 %v1120_v22, %v1119_v18  ;;  %v1169_v27 = vadd.f32 %v1168_v23, %v1167_v19 }
 0x152   : > { %v1062_v25 = vpack.c.bf16 %v706_v21, %v706_v21 }
 0x153   : > { %851 = vst.msk [vmem:[%s1567_s7 + $0x20] sm:$0xf] %vm842_vm1, %v1046_v24 }
 0x154   : > { %v691_v28 = vld [vmem:[#allocation2 + $0x48] sm:$0xff]  ;;  %867 = vst.msk [vmem:[%s1567_s7 + $0x60] sm:$0xf] %vm842_vm1, %v1062_v25 }
 0x155   : > { %v707_v29 = vld [vmem:[#allocation2 + $0xc8] sm:$0xff]  ;;  %v1047_v30 = vpack.c.bf16 %v691_v28, %v691_v28  ;;  %661 = vst.msk [vmem:[#allocation2 + $0x58] sm:$0xff] %vm649_vm0, %v1121_v26  ;;  %677 = vst.msk [vmem:[#allocation2 + $0xd8] sm:$0xff] %vm649_vm0, %v1169_v27  ;;  %v1122_v32 = vpop.f32.mrb[24].mxu0  ;;  %v1170_v33 = vpop.f32.mrb[24].mxu1 }
 0x156   : > { %v1063_v31 = vpack.c.bf16 %v707_v29, %v707_v29  ;;  %v1123_v34 = vpop.f32.mrb[25].mxu0  ;;  %v1171_v35 = vpop.f32.mrb[25].mxu1 }
 0x157   : > { %852 = vst.msk [vmem:[%s1567_s7 + $0x24] sm:$0xf] %vm842_vm1, %v1047_v30  ;;  %v1124_v36 = vadd.f32 %v1123_v34, %v1122_v32  ;;  %v1172_v37 = vadd.f32 %v1171_v35, %v1170_v33  ;;  %v1125_v38 = vpop.f32.mrb[26].mxu0  ;;  %v1173_v39 = vpop.f32.mrb[26].mxu1 }
 0x158   : > { %868 = vst.msk [vmem:[%s1567_s7 + $0x64] sm:$0xf] %vm842_vm1, %v1063_v31  ;;  %v692_v40 = vld [vmem:[#allocation2 + $0x50] sm:$0xff]  ;;  %v1126_v42 = vpop.f32.mrb[27].mxu0  ;;  %v1174_v43 = vpop.f32.mrb[27].mxu1 }
 0x159   : > { %v708_v41 = vld [vmem:[#allocation2 + $0xd0] sm:$0xff]  ;;  %v1048_v44 = vpack.c.bf16 %v692_v40, %v692_v40  ;;  %662 = vst.msk [vmem:[#allocation2 + $0x60] sm:$0xff] %vm649_vm0, %v1124_v36  ;;  %678 = vst.msk [vmem:[#allocation2 + $0xe0] sm:$0xff] %vm649_vm0, %v1172_v37  ;;  %v1127_v46 = vadd.f32 %v1126_v42, %v1125_v38  ;;  %v1175_v47 = vadd.f32 %v1174_v43, %v1173_v39 }
 0x15a   : > { %v1064_v45 = vpack.c.bf16 %v708_v41, %v708_v41 }
 0x15b   : > { %853 = vst.msk [vmem:[%s1567_s7 + $0x28] sm:$0xf] %vm842_vm1, %v1048_v44 }
 0x15c   : > { %v693_v48 = vld [vmem:[#allocation2 + $0x58] sm:$0xff]  ;;  %869 = vst.msk [vmem:[%s1567_s7 + $0x68] sm:$0xf] %vm842_vm1, %v1064_v45 }
 0x15d   : > { %v709_v49 = vld [vmem:[#allocation2 + $0xd8] sm:$0xff]  ;;  %v1049_v50 = vpack.c.bf16 %v693_v48, %v693_v48  ;;  %663 = vst.msk [vmem:[#allocation2 + $0x68] sm:$0xff] %vm649_vm0, %v1127_v46  ;;  %679 = vst.msk [vmem:[#allocation2 + $0xe8] sm:$0xff] %vm649_vm0, %v1175_v47  ;;  %v1128_v52 = vpop.f32.mrb[28].mxu0  ;;  %v1176_v53 = vpop.f32.mrb[28].mxu1 }
 0x15e   : > { %v1065_v51 = vpack.c.bf16 %v709_v49, %v709_v49  ;;  %v1129_v54 = vpop.f32.mrb[29].mxu0  ;;  %v1177_v55 = vpop.f32.mrb[29].mxu1 }
 0x15f   : > { %854 = vst.msk [vmem:[%s1567_s7 + $0x2c] sm:$0xf] %vm842_vm1, %v1049_v50  ;;  %v1130_v56 = vadd.f32 %v1129_v54, %v1128_v52  ;;  %v1178_v57 = vadd.f32 %v1177_v55, %v1176_v53  ;;  %v1131_v58 = vpop.f32.mrb[30].mxu0  ;;  %v1179_v59 = vpop.f32.mrb[30].mxu1 }
 0x160   : > { %870 = vst.msk [vmem:[%s1567_s7 + $0x6c] sm:$0xf] %vm842_vm1, %v1065_v51  ;;  %v694_v60 = vld [vmem:[#allocation2 + $0x60] sm:$0xff]  ;;  %v1132_v62 = vpop.f32.mrb[31].mxu0  ;;  %v1180_v63 = vpop.f32.mrb[31].mxu1 }
 0x161   : > { %v710_v61 = vld [vmem:[#allocation2 + $0xe0] sm:$0xff]  ;;  %v1050_v0 = vpack.c.bf16 %v694_v60, %v694_v60  ;;  %664 = vst.msk [vmem:[#allocation2 + $0x70] sm:$0xff] %vm649_vm0, %v1130_v56  ;;  %680 = vst.msk [vmem:[#allocation2 + $0xf0] sm:$0xff] %vm649_vm0, %v1178_v57  ;;  %v1133_v2 = vadd.f32 %v1132_v62, %v1131_v58  ;;  %v1181_v3 = vadd.f32 %v1180_v63, %v1179_v59 }
 0x162   : > { %v1066_v1 = vpack.c.bf16 %v710_v61, %v710_v61 }
 0x163   : > { %855 = vst.msk [vmem:[%s1567_s7 + $0x30] sm:$0xf] %vm842_vm1, %v1050_v0 }
 0x164   : > { %v695_v4 = vld [vmem:[#allocation2 + $0x68] sm:$0xff]  ;;  %871 = vst.msk [vmem:[%s1567_s7 + $0x70] sm:$0xf] %vm842_vm1, %v1066_v1 }
 0x165   : > { %v711_v5 = vld [vmem:[#allocation2 + $0xe8] sm:$0xff]  ;;  %v1051_v6 = vpack.c.bf16 %v695_v4, %v695_v4  ;;  %665 = vst.msk [vmem:[#allocation2 + $0x78] sm:$0xff] %vm649_vm0, %v1133_v2  ;;  %681 = vst.msk [vmem:[#allocation2 + $0xf8] sm:$0xff] %vm649_vm0, %v1181_v3 }
 0x166   : > { %v1067_v7 = vpack.c.bf16 %v711_v5, %v711_v5 }
 0x167   : > { %856 = vst.msk [vmem:[%s1567_s7 + $0x34] sm:$0xf] %vm842_vm1, %v1051_v6 }
 0x168   : > { %872 = vst.msk [vmem:[%s1567_s7 + $0x74] sm:$0xf] %vm842_vm1, %v1067_v7  ;;  %v696_v8 = vld [vmem:[#allocation2 + $0x70] sm:$0xff] }
 0x169   : > { %v712_v9 = vld [vmem:[#allocation2 + $0xf0] sm:$0xff]  ;;  %v1052_v10 = vpack.c.bf16 %v696_v8, %v696_v8 }
 0x16a   : > { %v1068_v11 = vpack.c.bf16 %v712_v9, %v712_v9 }
 0x16b   : > { %857 = vst.msk [vmem:[%s1567_s7 + $0x38] sm:$0xf] %vm842_vm1, %v1052_v10 }
 0x16c   : > { %v697_v12 = vld [vmem:[#allocation2 + $0x78] sm:$0xff]  ;;  %873 = vst.msk [vmem:[%s1567_s7 + $0x78] sm:$0xf] %vm842_vm1, %v1068_v11 }
 0x16d   : > { %v713_v13 = vld [vmem:[#allocation2 + $0xf8] sm:$0xff]  ;;  %v1053_v14 = vpack.c.bf16 %v697_v12, %v697_v12 }
 0x16e   : > { %v1069_v15 = vpack.c.bf16 %v713_v13, %v713_v13 }
 0x16f   : > { %858 = vst.msk [vmem:[%s1567_s7 + $0x3c] sm:$0xf] %vm842_vm1, %v1053_v14 }
 0x170   : > { %874 = vst.msk [vmem:[%s1567_s7 + $0x7c] sm:$0xf] %vm842_vm1, %v1069_v15 }
 0x171 PF: > { %p12_p8 = scmp.ge.s32.totalorder %s1407_s14, 10   ;;  %s1680_s9 = smov %s1359_s10 }
 0x172   : > { %s1681_s10 = smov %s1363_s11  ;;  %s1682_s11 = smov %s1417_s17 }
 0x173   : > { %s1683_s12 = smov %s1407_s14  ;;  %14 = sbr.rel (!%p12_p8) target bundleno = 3 (0x3), region = 68 }
 0x17a   :  { %897 = vsyncpa [#allocation4], 1 }
 0x17b   :  { %899 = vsyncpa [#allocation4 + $0x1], 1 }

</bundles_post_ra>
